<compile_context>
chip_gen: v5e
topology: v5e:2x2
jax: 0.10.0
libtpu: 0.0.40
codegen_flags: <defaults>
</compile_context>

<pallas_src>
import functools

import jax
import jax.numpy as jnp
from jax.experimental import pallas as pl
from jax.experimental.pallas import tpu as pltpu


def _chan_layernorm_kernel(x_ref, g_ref, b_ref, o_ref, *, eps):
    # x_ref: (1, C, tm)  -- channels on sublanes, pixels on lanes
    # g_ref: (1, C, 1), b_ref: (1, C, 1)
    # o_ref: (1, C, tm)
    x = x_ref[...].astype(jnp.float32)
    mean = jnp.mean(x, axis=1, keepdims=True)             # (1, 1, tm)
    xc = x - mean
    var = jnp.mean(xc * xc, axis=1, keepdims=True)        # unbiased=False
    # Note: eps is added to std (not var), matching the PyTorch module.
    inv = 1.0 / (jnp.sqrt(var) + eps)                     # (1, 1, tm) only
    g = g_ref[...].astype(jnp.float32)
    b = b_ref[...].astype(jnp.float32)
    o_ref[...] = (xc * inv * g + b).astype(o_ref.dtype)


def _pick_pixel_tile(hw, c, itemsize, vmem_budget=24 << 20):
    """Largest lane-dense pixel tile that fits the VMEM budget.

    Per grid step the pipeline holds the input tile and the output tile, each
    double-buffered: 4 * C * tm * itemsize bytes.  If the whole image fits,
    use the full H*W (a full-extent block is always layout-legal); otherwise
    use the largest multiple-of-128 tile that fits (>= 128)."""
    max_tm = vmem_budget // (4 * c * itemsize)
    if hw <= max_tm:
        return hw
    return max(128, (max_tm // 128) * 128)


@functools.partial(jax.jit, static_argnames=("eps",))
def layernorm_nchw(x, g, b, *, eps=1e-5):
    """Channel-wise LayerNorm (AVT variant) on an NCHW tensor via Pallas."""
    N, C, H, W = x.shape
    HW = H * W
    tm = _pick_pixel_tile(HW, C, x.dtype.itemsize)

    x3 = x.reshape(N, C, HW)          # contiguous view, no transpose
    g3 = g.reshape(1, C, 1)
    b3 = b.reshape(1, C, 1)

    grid = (N, pl.cdiv(HW, tm))

    out = pl.pallas_call(
        functools.partial(_chan_layernorm_kernel, eps=eps),
        out_shape=jax.ShapeDtypeStruct((N, C, HW), x.dtype),
        grid_spec=pltpu.PrefetchScalarGridSpec(
            num_scalar_prefetch=0,
            grid=grid,
            in_specs=[
                pl.BlockSpec((1, C, tm), lambda n, i: (n, 0, i)),   # x tile
                pl.BlockSpec((1, C, 1), lambda n, i: (0, 0, 0)),    # g
                pl.BlockSpec((1, C, 1), lambda n, i: (0, 0, 0)),    # b
            ],
            out_specs=pl.BlockSpec((1, C, tm), lambda n, i: (n, 0, i)),
        ),
        compiler_params=pltpu.CompilerParams(
            dimension_semantics=("parallel", "parallel")),
    )(x3, g3, b3)

    return out.reshape(N, C, H, W)


def prenorm(x, g, b, fn=None, *, eps=1e-5):
    """PreNorm.forward: fn(LayerNorm(x)).  `fn` is any JAX callable."""
    y = layernorm_nchw(x, g, b, eps=eps)
    return fn(y) if fn is not None else y


def _reference(x, g, b, eps=1e-5):
    """Pure-JAX reference with identical semantics to the PyTorch module."""
    mean = jnp.mean(x, axis=1, keepdims=True)
    var = jnp.var(x, axis=1, keepdims=True)       # ddof=0 == unbiased=False
    std = jnp.sqrt(var)
    return (x - mean) / (std + eps) * g + b


if __name__ == "__main__":
    key = jax.random.PRNGKey(0)
    k_x, k_g, k_b = jax.random.split(key, 3)

    # Small shapes consistent with the module: batch=2, channels=4, 16x16.
    N, C, H, W = 2, 4, 16, 16
    x = jax.random.normal(k_x, (N, C, H, W), dtype=jnp.float32)

    # g/b are initialized to ones/zeros in the module; perturb them so the
    # affine path is actually exercised (still deterministic via PRNGKey(0)).
    g = 1.0 + 0.1 * jax.random.normal(k_g, (1, C, 1, 1), dtype=jnp.float32)
    b = 0.1 * jax.random.normal(k_b, (1, C, 1, 1), dtype=jnp.float32)

    fn = lambda t: t   # identity stand-in for the wrapped sub-module

    out = prenorm(x, g, b, fn=fn)
    out = jax.block_until_ready(out)

    ref = _reference(x, g, b)
    assert out.shape == (N, C, H, W)
    assert jnp.allclose(out, ref, atol=1e-5, rtol=1e-5)

    print("KERNEL_OK")
</pallas_src>

<mosaic_0001>
module attributes {stable_mosaic.version = 11 : i64} {
  func.func @_chan_layernorm_kernel(%arg0: i32, %arg1: i32, %arg2: memref<1x4x256xf32, #tpu.memory_space<vmem>>, %arg3: memref<1x4x1xf32, #tpu.memory_space<vmem>>, %arg4: memref<1x4x1xf32, #tpu.memory_space<vmem>>, %arg5: memref<1x4x256xf32, #tpu.memory_space<vmem>>) attributes {dimension_semantics = [#tpu.dimension_semantics<parallel>, #tpu.dimension_semantics<parallel>], iteration_bounds = array<i64: 2, 1>, scalar_prefetch = 0 : i64, scratch_operands = 0 : i64, tpu.core_type = #tpu.core_type<tc>, window_params = [{transform_indices = @transform_0, window_bounds = array<i64: 1, 4, 256>}, {pipeline_mode = #tpu.pipeline_mode<synchronous>, transform_indices = @transform_1, window_bounds = array<i64: 1, 4, 1>}, {pipeline_mode = #tpu.pipeline_mode<synchronous>, transform_indices = @transform_2, window_bounds = array<i64: 1, 4, 1>}, {transform_indices = @transform_3, window_bounds = array<i64: 1, 4, 256>}]} {
    %c0 = arith.constant 0 : index
    %c0_0 = arith.constant 0 : index
    %c0_1 = arith.constant 0 : index
    %0 = vector.load %arg2[%c0, %c0_0, %c0_1] : memref<1x4x256xf32, #tpu.memory_space<vmem>>, vector<1x4x256xf32>
    %cst = arith.constant dense<0.000000e+00> : vector<1x256xf32>
    %1 = vector.multi_reduction <add>, %0, %cst [1] : vector<1x4x256xf32> to vector<1x256xf32>
    %2 = vector.shape_cast %1 : vector<1x256xf32> to vector<1x1x256xf32>
    %cst_2 = arith.constant 4.000000e+00 : f32
    %3 = vector.broadcast %cst_2 : f32 to vector<1x1x256xf32>
    %4 = arith.divf %2, %3 : vector<1x1x256xf32>
    %5 = vector.broadcast %4 : vector<1x1x256xf32> to vector<1x4x256xf32>
    %6 = arith.subf %0, %5 : vector<1x4x256xf32>
    %7 = arith.mulf %6, %6 : vector<1x4x256xf32>
    %cst_3 = arith.constant dense<0.000000e+00> : vector<1x256xf32>
    %8 = vector.multi_reduction <add>, %7, %cst_3 [1] : vector<1x4x256xf32> to vector<1x256xf32>
    %9 = vector.shape_cast %8 : vector<1x256xf32> to vector<1x1x256xf32>
    %cst_4 = arith.constant 4.000000e+00 : f32
    %10 = vector.broadcast %cst_4 : f32 to vector<1x1x256xf32>
    %11 = arith.divf %9, %10 : vector<1x1x256xf32>
    %12 = math.sqrt %11 : vector<1x1x256xf32>
    %cst_5 = arith.constant 9.99999974E-6 : f32
    %13 = vector.broadcast %cst_5 : f32 to vector<1x1x256xf32>
    %14 = arith.addf %12, %13 : vector<1x1x256xf32>
    %cst_6 = arith.constant 1.000000e+00 : f32
    %15 = vector.broadcast %cst_6 : f32 to vector<1x1x256xf32>
    %16 = arith.divf %15, %14 : vector<1x1x256xf32>
    %c0_7 = arith.constant 0 : index
    %c0_8 = arith.constant 0 : index
    %c0_9 = arith.constant 0 : index
    %17 = vector.load %arg3[%c0_7, %c0_8, %c0_9] : memref<1x4x1xf32, #tpu.memory_space<vmem>>, vector<1x4x1xf32>
    %c0_10 = arith.constant 0 : index
    %c0_11 = arith.constant 0 : index
    %c0_12 = arith.constant 0 : index
    %18 = vector.load %arg4[%c0_10, %c0_11, %c0_12] : memref<1x4x1xf32, #tpu.memory_space<vmem>>, vector<1x4x1xf32>
    %19 = vector.broadcast %16 : vector<1x1x256xf32> to vector<1x4x256xf32>
    %20 = arith.mulf %6, %19 : vector<1x4x256xf32>
    %21 = vector.broadcast %17 : vector<1x4x1xf32> to vector<1x4x256xf32>
    %22 = arith.mulf %20, %21 : vector<1x4x256xf32>
    %23 = vector.broadcast %18 : vector<1x4x1xf32> to vector<1x4x256xf32>
    %24 = arith.addf %22, %23 : vector<1x4x256xf32>
    %c0_13 = arith.constant 0 : index
    %c0_14 = arith.constant 0 : index
    %c0_15 = arith.constant 0 : index
    %25 = vector.load %arg5[%c0_13, %c0_14, %c0_15] : memref<1x4x256xf32, #tpu.memory_space<vmem>>, vector<1x4x256xf32>
    tpu.vector_store %arg5[%c0_13, %c0_14, %c0_15], %24 {strides = array<i32>} : memref<1x4x256xf32, #tpu.memory_space<vmem>>, vector<1x4x256xf32>,
    return
  }
  func.func @transform_0(%arg0: i32, %arg1: i32) -> (i32, i32, i32) {
    %c0_i32 = arith.constant 0 : i32
    %c0_i32_0 = arith.constant 0 : i32
    return %arg0, %c0_i32, %arg1 : i32, i32, i32
  }
  func.func @transform_1(%arg0: i32, %arg1: i32) -> (i32, i32, i32) {
    %c0_i32 = arith.constant 0 : i32
    %c0_i32_0 = arith.constant 0 : i32
    %c0_i32_1 = arith.constant 0 : i32
    %c0_i32_2 = arith.constant 0 : i32
    return %c0_i32, %c0_i32_0, %c0_i32_1 : i32, i32, i32
  }
  func.func @transform_2(%arg0: i32, %arg1: i32) -> (i32, i32, i32) {
    %c0_i32 = arith.constant 0 : i32
    %c0_i32_0 = arith.constant 0 : i32
    %c0_i32_1 = arith.constant 0 : i32
    %c0_i32_2 = arith.constant 0 : i32
    return %c0_i32, %c0_i32_0, %c0_i32_1 : i32, i32, i32
  }
  func.func @transform_3(%arg0: i32, %arg1: i32) -> (i32, i32, i32) {
    %c0_i32 = arith.constant 0 : i32
    %c0_i32_0 = arith.constant 0 : i32
    return %arg0, %c0_i32, %arg1 : i32, i32, i32
  }
}

</mosaic_0001>

<bundles_post_ra>
// kernel: layernorm_nchw.1
= control target key start
LH: loop header
LB: loop body
LE: loop exit
PB: predicated region body
PF: predicated region fallthrough
CT: control target
= control target key end

     0   :  { %s540_s12 = smov 0   ;;  %s542_s13 = smov 0   ;;  %s597_s0 = inlined_call_operand.vmem [shape: f32[2,4,256], index: 0, kind: input, shape index: {}]   ;;  %s598_s1 = inlined_call_operand.vmem [shape: f32[1,4,1], index: 1, kind: input, shape index: {}]   ;;  %s599_s2 = inlined_call_operand.vmem [shape: f32[1,4,1], index: 2, kind: input, shape index: {}]   ;;  %s600_s3 = inlined_call_operand.vmem [shape: f32[2,4,256], index: 3, kind: output, shape index: {}]  }
   0x1   :  { %s544_s14 = smov 0  }
   0x2 LB: > { %s25_s15 = sadd.s32 1, %s511_s13  ;;  %p446_p0 = scmp.ge.s32.totalorder %s515_s14, 1  ;;  %s515_s14 = sphi %s544_s14, %s13_s14   ;;  %s511_s13 = sphi %s542_s13, %s602_s13   ;;  %s507_s12 = sphi %s540_s12, %s601_s12  }
   0x3   : > { %p27_p1 = scmp.ge.s32.totalorder %s25_s15, 2  ;;  %p158_p2 = scmp.lt.s32.totalorder %s515_s14, 3 }
   0x5   : > { %s604_s15 = smov (%p27_p1, %s25_s15), 0  ;;  %p159_p3 = pnand %p446_p0, %p158_p2 }
   0x6   : > { %p191_p4 = scmp.lt.s32.totalorder (!%p159_p3), %s507_s12, 1 }
   0x7   : > { %162 = sbr.rel (%p159_p3) target bundleno = 142 (0x8e), region = 32 }
   0xc   : > { %v326_v0 = vld [vmem:[%s598_s1] sm:$0xf]  ;;  %v517_v1 = vmov 0   ;;  %s606_s12 = smov (!%p191_p4, %s507_s12), 1  ;;  %v518_v2 = vmov 4.0   ;;  %vm217_vm0 = vcmask 1043456  }
   0xd   : > { %482 = vset.pattern.permute.xlu0 %v517_v1  ;;  %483 = vrcp.f32 %v518_v2  ;;  %s453_s18 = sshll.u32 %s606_s12, 3  ;;  %v327_v4 = vld [vmem:[%s599_s2] sm:$0xf] }
   0xe   : > { %336 = vperm.xlu0 %482, %v326_v0   ;;  %s198_s21 = scalar_lea.vmem %s597_s0, %s453_s18  ;;  %s208_s26 = scalar_lea.vmem %s600_s3, %s453_s18 }
   0xf   : > { %v210_v3 = vld [vmem:[%s198_s21] sm:$0xff] }
  0x10   : > { %212 = vst [vmem:[#allocation1] ss:$2 sm:$0xff] %v210_v3 }
  0x13   : > { %v484_v5 = vpop.eup %483 }
  0x14   : > { %v233_v6 = vmul.f32 4.0, %v484_v5  ;;  %vm237_vm1 = vweird.f32 %v484_v5 }
  0x16   : > { %346 = vperm.xlu0 %482, %v327_v4   ;;  %v234_v7 = vsub.f32 1.0, %v233_v6 }
  0x17   : > { %v213_v8 = vld.sshfl [vmem:[#allocation1] sm:$0xff pattern:$0x75316420]  ;;  %v214_v9 = vld.sshfl [vmem:[#allocation1 + $0x8] sm:$0xff pattern:$0x75316420] }
  0x18   : > { %v218_v10 = vsel %vm217_vm0, %v213_v8, 0.0  ;;  %v225_v11 = vsel %vm217_vm0, %v214_v9, 0.0  ;;  %v235_v14 = vmul.f32 %v484_v5, %v234_v7 }
  0x19   : > { %v219_v12 = vrot.slane %v218_v10, 4  ;;  %v226_v13 = vrot.slane %v225_v11, 4 }
  0x1a   : > { %v236_v19 = vadd.f32 %v484_v5, %v235_v14 }
  0x1b   : > { %v220_v15 = vadd.f32 %v219_v12, %v218_v10  ;;  %v227_v16 = vadd.f32 %v226_v13, %v225_v11 }
  0x1c   : > { %v238_v24 = vsel %vm237_vm1, %v484_v5, %v236_v19 }
  0x1d   : > { %v221_v17 = vrot.slane %v220_v15, 2  ;;  %v228_v18 = vrot.slane %v227_v16, 2 }
  0x1f   : > { %v222_v20 = vadd.f32 %v221_v17, %v220_v15  ;;  %v229_v21 = vadd.f32 %v228_v18, %v227_v16 }
  0x21   : > { %v223_v22 = vrot.slane %v222_v20, 1  ;;  %v230_v23 = vrot.slane %v229_v21, 1 }
  0x23   : > { %v224_v25 = vadd.f32 %v223_v22, %v222_v20  ;;  %v231_v26 = vadd.f32 %v230_v23, %v229_v21 }
  0x25   : > { %v239_v27 = vmul.f32 %v238_v24, %v224_v25  ;;  %v240_v28 = vmul.f32 %v238_v24, %v231_v26 }
  0x27   : > { %v243_v29 = vrot.slane %v240_v28, 4  ;;  %v519_v28 = vmov 839922192  }
  0x29   : > { %v244_v30 = vsel %vm217_vm0, %v239_v27, %v243_v29  ;;  %v339_v29 = vunpack.c.l.s4 %v519_v28 }
  0x2a   : > { %v575_v31 = vsub.f32 %v210_v3, %v244_v30 }
  0x2c   : > { %v247_v32 = vmul.f32 %v575_v31, %v575_v31 }
  0x2e   : > { %249 = vst [vmem:[#allocation1] ss:$2 sm:$0xff] %v247_v32 }
  0x35   : > { %v250_v33 = vld.sshfl [vmem:[#allocation1] sm:$0xff pattern:$0x75316420]  ;;  %v251_v34 = vld.sshfl [vmem:[#allocation1 + $0x8] sm:$0xff pattern:$0x75316420] }
  0x36   : > { %v254_v35 = vsel %vm217_vm0, %v250_v33, 0.0  ;;  %v261_v36 = vsel %vm217_vm0, %v251_v34, 0.0  ;;  %v340_v34 = vunpack.c.0.s8 %v339_v29 }
  0x37   : > { %v255_v37 = vrot.slane %v254_v35, 4  ;;  %v262_v38 = vrot.slane %v261_v36, 4 }
  0x39   : > { %v256_v39 = vadd.f32 %v255_v37, %v254_v35  ;;  %v263_v40 = vadd.f32 %v262_v38, %v261_v36 }
  0x3b   : > { %v257_v41 = vrot.slane %v256_v39, 2  ;;  %v264_v42 = vrot.slane %v263_v40, 2 }
  0x3d   : > { %v258_v43 = vadd.f32 %v257_v41, %v256_v39  ;;  %v265_v44 = vadd.f32 %v264_v42, %v263_v40 }
  0x3f   : > { %v259_v45 = vrot.slane %v258_v43, 1  ;;  %v266_v46 = vrot.slane %v265_v44, 1 }
  0x41   : > { %v260_v47 = vadd.f32 %v259_v45, %v258_v43  ;;  %v267_v48 = vadd.f32 %v266_v46, %v265_v44 }
  0x43   : > { %v268_v49 = vmul.f32 %v260_v47, %v238_v24  ;;  %v269_v50 = vmul.f32 %v267_v48, %v238_v24 }
  0x45   : > { %485 = vrsqrt.f32 %v268_v49  ;;  %vm277_vm2 = vcmp.eq.f32.partialorder %v268_v49, inf  ;;  %v280_v62 = vand.u32 2147483648, %v268_v49  ;;  %vm279_vm3 = vcmp.eq.f32.partialorder %v268_v49, 0.0 }
  0x46   : > { %487 = vrsqrt.f32 %v269_v50  ;;  %vm289_vm4 = vcmp.eq.f32.partialorder %v269_v50, inf  ;;  %v292_v1 = vand.u32 2147483648, %v269_v50  ;;  %vm291_vm5 = vcmp.eq.f32.partialorder %v269_v50, 0.0 }
  0x4b   : > { %v486_v51 = vpop.eup %485 }
  0x4c   : > { %v488_v52 = vpop.eup %487  ;;  %v271_v53 = vmul.f32 %v486_v51, %v268_v49 }
  0x4d   : > { %v283_v54 = vmul.f32 %v488_v52, %v269_v50 }
  0x4e   : > { %v272_v55 = vmul.f32 %v486_v51, %v271_v53 }
  0x4f   : > { %v284_v56 = vmul.f32 %v488_v52, %v283_v54 }
  0x50   : > { %v273_v57 = vmul.f32 0.5, %v272_v55 }
  0x51   : > { %v285_v58 = vmul.f32 0.5, %v284_v56 }
  0x52   : > { %v274_v59 = vsub.f32 1.5, %v273_v57 }
  0x53   : > { %v286_v60 = vsub.f32 1.5, %v285_v58 }
  0x54   : > { %v275_v61 = vmul.f32 %v486_v51, %v274_v59 }
  0x55   : > { %v287_v63 = vmul.f32 %v488_v52, %v286_v60 }
  0x56   : > { %v276_v0 = vmul.f32 %v275_v61, %v268_v49 }
  0x57   : > { %v288_v2 = vmul.f32 %v287_v63, %v269_v50 }
  0x58   : > { %v278_v3 = vsel %vm277_vm2, %v268_v49, %v276_v0 }
  0x59   : > { %v281_v4 = vsel %vm279_vm3, %v280_v62, %v278_v3  ;;  %v290_v5 = vsel %vm289_vm4, %v269_v50, %v288_v2 }
  0x5a   : > { %v293_v6 = vsel %vm291_vm5, %v292_v1, %v290_v5  ;;  %v294_v8 = vadd.f32 1e-05, %v281_v4 }
  0x5b   : > { %v295_v7 = vadd.f32 1e-05, %v293_v6 }
  0x5c   : > { %vm301_vm9 = vweird.f32 %v294_v8  ;;  %v307_v20 = vand.u32 2147483648, %v294_v8  ;;  %v305_v23 = vand.u32 2147483647, %v294_v8 }
  0x5d   : > { %489 = vrcp.f32 %v295_v7  ;;  %vm316_vm6 = vweird.f32 %v295_v7  ;;  %v322_v16 = vand.u32 2147483648, %v295_v7  ;;  %v320_v19 = vand.u32 2147483647, %v295_v7 }
  0x5e   : > { %491 = vrcp.f32 %v294_v8  ;;  %v308_v25 = vor.u32 1.1754944e-38, %v307_v20  ;;  %vm306_vm13 = vcmp.eq.f32.partialorder %v305_v23, 8.507059e+37 }
  0x5f   : > { %v323_v21 = vor.u32 1.1754944e-38, %v322_v16  ;;  %vm321_vm11 = vcmp.eq.f32.partialorder %v320_v19, 8.507059e+37 }
  0x63   : > { %v490_v9 = vpop.eup %489 }
  0x64   : > { %v312_v10 = vmul.f32 %v490_v9, %v295_v7  ;;  %v492_v11 = vpop.eup %491  ;;  %vm317_vm7 = vweird.f32 %v490_v9 }
  0x65   : > { %v297_v12 = vmul.f32 %v492_v11, %v294_v8  ;;  %vm318_vm8 = vmor %vm316_vm6, %vm317_vm7  ;;  %vm302_vm10 = vweird.f32 %v492_v11 }
  0x66   : > { %v313_v13 = vsub.f32 1.0, %v312_v10  ;;  %vm303_vm12 = vmor %vm301_vm9, %vm302_vm10 }
  0x67   : > { %v298_v14 = vsub.f32 1.0, %v297_v12 }
  0x68   : > { %v314_v15 = vmul.f32 %v490_v9, %v313_v13 }
  0x69   : > { %v299_v17 = vmul.f32 %v492_v11, %v298_v14 }
  0x6a   : > { %v315_v18 = vadd.f32 %v490_v9, %v314_v15 }
  0x6b   : > { %v300_v22 = vadd.f32 %v492_v11, %v299_v17 }
  0x6c   : > { %v319_v24 = vsel %vm318_vm8, %v490_v9, %v315_v18 }
  0x6d   : > { %v324_v26 = vsel %vm321_vm11, %v323_v21, %v319_v24  ;;  %v304_v27 = vsel %vm303_vm12, %v492_v11, %v300_v22 }
  0x6e   : > { %v330_v30 = vrot.slane %v324_v26, 4  ;;  %v309_v32 = vsel %vm306_vm13, %v308_v25, %v304_v27 }
  0x70   : > { %v331_v35 = vsel %vm217_vm0, %v309_v32, %v330_v30 }
  0x71   : > { %v333_v36 = vmul.f32 %v331_v35, %v575_v31 }
  0x80   : > { %v337_v33 = vpop.permute.xlu0 %336 }
  0x81   : > { %v341_v37 = vperm.slane %v337_v33, %v340_v34 }
  0x83   : > { %v343_v39 = vmul.f32 %v341_v37, %v333_v36 }
  0x88   : > { %v347_v38 = vpop.permute.xlu0 %346 }
  0x89   : > { %v351_v40 = vperm.slane %v347_v38, %v340_v34 }
  0x8b   : > { %v353_v41 = vadd.f32 %v351_v40, %v343_v39 }
  0x8d   : > { %354 = vst [vmem:[%s208_s26] sm:$0xff] %v353_v41 }
  0x8e PF: > { %s13_s14 = sadd.s32 1, %s515_s14   ;;  %s601_s12 = smov %s511_s13 }
  0x8f   : > { %p10_p5 = scmp.ge.s32.totalorder %s13_s14, 4   ;;  %s602_s13 = smov %s604_s15 }
  0x91   :  { %12 = sbr.rel (!%p10_p5) target bundleno = 2 (0x2), region = 62 }

</bundles_post_ra>
